<compile_context>
chip_gen: v7x
topology: tpu7x:2x2x1
jax: 0.10.0
libtpu: 0.0.40
codegen_flags: <defaults>
</compile_context>

<pallas_src>
import functools

import jax
import jax.numpy as jnp
from jax.experimental import pallas as pl
from jax.experimental.pallas import tpu as pltpu
import numpy as np


def _largest_divisor(n, candidates):
    for c in candidates:
        if c > 0 and n % c == 0:
            return c
    return None


# ---------------------------------------------------------------------------
# Pass 1: global statistics.  grid = (phase, tile); phase 0 -> running sum,
# phase 1 -> running sum of squared deviations about the mean.  acc_ref is a
# (2,) f32 SMEM scratch; the (2,) SMEM output is written once at the end.
# ---------------------------------------------------------------------------
def _stats_kernel(x_ref, o_ref, acc_ref, *, n_total):
    p = pl.program_id(0)
    t = pl.program_id(1)

    @pl.when(jnp.logical_and(p == 0, t == 0))
    def _init():
        acc_ref[0] = jnp.float32(0.0)
        acc_ref[1] = jnp.float32(0.0)

    x = x_ref[...].astype(jnp.float32)

    @pl.when(p == 0)
    def _accum_sum():
        acc_ref[0] = acc_ref[0] + jnp.sum(x)

    @pl.when(p == 1)
    def _accum_ssd():
        mean = acc_ref[0] / jnp.float32(n_total)
        d = x - mean
        acc_ref[1] = acc_ref[1] + jnp.sum(d * d)

    @pl.when(jnp.logical_and(p == 1, t == pl.num_programs(1) - 1))
    def _finalize():
        o_ref[0] = acc_ref[0]
        o_ref[1] = acc_ref[1]


# ---------------------------------------------------------------------------
# Pass 2: elementwise apply.  out = x * scale + shift with per-row (per-sample)
# scale/shift; two VPU ops per element, all math in f32.
# ---------------------------------------------------------------------------
def _apply_kernel(scale_ref, shift_ref, x_ref, o_ref):
    x = x_ref[...].astype(jnp.float32)
    o_ref[...] = (x * scale_ref[...] + shift_ref[...]).astype(o_ref.dtype)


def adain_forward(x, z_lr, w_ab, b_ab):
    """x: (B, C, H, W), z_lr: (B, L), w_ab: (L, 2), b_ab: (1, 2) -> (B, C, H, W)"""
    B, C, H, W = x.shape
    CHW = C * H * W
    N = B * CHW

    # --- alpha / beta: tiny GEMV, not worth the MXU inside the kernel -------
    ab = (z_lr @ w_ab + b_ab).astype(jnp.float32)          # (B, 2)
    alpha = ab[:, 0:1]                                      # (B, 1)
    beta = ab[:, 1:2]                                       # (B, 1)

    # --- pass 1: global sum / sum of squared deviations ----------------------
    lanes = _largest_divisor(N, (512, 256, 128))
    if lanes is None:                  # N not a multiple of 128: single block
        rows, lanes = 1, N
    else:
        rows = N // lanes
    x_stats = x.reshape(rows, lanes)
    row_tile = _largest_divisor(rows, (1024, 512, 256, 128, 64, 32, 16, 8)) or rows
    n_tiles = rows // row_tile

    stats = pl.pallas_call(
        functools.partial(_stats_kernel, n_total=N),
        grid=(2, n_tiles),
        in_specs=[pl.BlockSpec((row_tile, lanes), lambda p, t: (t, 0))],
        out_specs=pl.BlockSpec(memory_space=pltpu.MemorySpace.SMEM),
        out_shape=jax.ShapeDtypeStruct((2,), jnp.float32),
        scratch_shapes=[pltpu.SMEM((2,), jnp.float32)],
        compiler_params=pltpu.CompilerParams(
            dimension_semantics=("arbitrary", "arbitrary")),
    )(x_stats)

    mean = stats[0] / N
    var = stats[1] / (N - 1)           # unbiased (torch.std default)
    std = jnp.sqrt(var)

    # fold alpha/std and the mean into a single per-sample scale/shift
    s = alpha / std                    # (B, 1)
    t = beta - s * mean                # (B, 1)

    # --- pass 2: tiled elementwise apply -------------------------------------
    # fold each sample's row into `rb` rows so the sublane dim is >= 8
    rb = 1
    if B < 8:
        for cand in (2, 4, 8, 16, 32, 64):
            if B * cand >= 8 and CHW % cand == 0:
                rb = cand
                break
    rows_a = B * rb
    lanes_a = CHW // rb
    x_apply = x.reshape(rows_a, lanes_a)
    s_rows = jnp.repeat(s, rb, axis=0)                      # (rows_a, 1)
    t_rows = jnp.repeat(t, rb, axis=0)                      # (rows_a, 1)

    max_tile_bytes = 4 << 20           # keep (in+out) double-buffered well under VMEM
    cands = tuple(c for c in (8192, 4096, 2048, 1024, 512, 256, 128)
                  if rows_a * c * 4 <= max_tile_bytes)
    tile = (_largest_divisor(lanes_a, cands) if cands else None) or lanes_a
    n_tiles_a = lanes_a // tile

    # TODO(synk): add input_output_aliases={2: 0} when the caller donates x.
    out = pl.pallas_call(
        _apply_kernel,
        grid=(n_tiles_a,),
        in_specs=[
            pl.BlockSpec((rows_a, 1), lambda i: (0, 0)),     # scale (resident)
            pl.BlockSpec((rows_a, 1), lambda i: (0, 0)),     # shift (resident)
            pl.BlockSpec((rows_a, tile), lambda i: (0, i)),  # x tile (streamed)
        ],
        out_specs=pl.BlockSpec((rows_a, tile), lambda i: (0, i)),
        out_shape=jax.ShapeDtypeStruct((rows_a, lanes_a), x.dtype),
        compiler_params=pltpu.CompilerParams(
            dimension_semantics=("parallel",)),
    )(s_rows, t_rows, x_apply)

    return out.reshape(B, C, H, W)


def adain_reference(x, z_lr, w_ab, b_ab):
    """Pure-JAX reference matching the PyTorch module."""
    ab = z_lr @ w_ab + b_ab
    alpha = ab[:, 0].reshape(-1, 1, 1, 1)
    beta = ab[:, 1].reshape(-1, 1, 1, 1)
    mean = jnp.mean(x)
    std = jnp.std(x, ddof=1)                                # torch.std: unbiased
    return alpha * (x - mean) / std + beta


if __name__ == "__main__":
    key = jax.random.PRNGKey(0)
    B, C, H, W = 2, 4, 16, 16
    latent_dim = 32

    k_x, k_z, k_wa, k_wb, k_ba, k_bb = jax.random.split(key, 6)
    x = jax.random.normal(k_x, (B, C, H, W), dtype=jnp.float32)
    z_lr = jax.random.normal(k_z, (B, latent_dim), dtype=jnp.float32)

    # nn.Linear(latent_dim, 1) init: U(-1/sqrt(L), 1/sqrt(L)) for weight and bias.
    bound = 1.0 / np.sqrt(latent_dim)
    w_alpha = jax.random.uniform(k_wa, (latent_dim,), jnp.float32, -bound, bound)
    w_beta = jax.random.uniform(k_wb, (latent_dim,), jnp.float32, -bound, bound)
    b_alpha = jax.random.uniform(k_ba, (), jnp.float32, -bound, bound)
    b_beta = jax.random.uniform(k_bb, (), jnp.float32, -bound, bound)

    w_ab = jnp.stack([w_alpha, w_beta], axis=1)             # (L, 2)
    b_ab = jnp.stack([b_alpha, b_beta]).reshape(1, 2)       # (1, 2)

    fwd = jax.jit(adain_forward)
    out = jax.block_until_ready(fwd(x, z_lr, w_ab, b_ab))

    ref = adain_reference(x, z_lr, w_ab, b_ab)
    np.testing.assert_allclose(np.asarray(out), np.asarray(ref), rtol=1e-5, atol=1e-5)

    print("KERNEL_OK")
</pallas_src>

<mosaic_0001>
module attributes {stable_mosaic.version = 11 : i64} {
  func.func @_stats_kernel(%arg0: i32, %arg1: i32, %arg2: memref<4x512xf32, #tpu.memory_space<vmem>>, %arg3: memref<2xf32, #tpu.memory_space<smem>>, %arg4: memref<2xf32, #tpu.memory_space<smem>>) attributes {dimension_semantics = [#tpu.dimension_semantics<arbitrary>, #tpu.dimension_semantics<arbitrary>], iteration_bounds = array<i64: 2, 1>, scalar_prefetch = 0 : i64, scratch_operands = 1 : i64, tpu.core_type = #tpu.core_type<tc>, window_params = [{transform_indices = @transform_0, window_bounds = array<i64: 4, 512>}, {transform_indices = @transform_1, window_bounds = array<i64: 2>}]} {
    %c0_i32 = arith.constant 0 : i32
    %0 = arith.cmpi eq, %arg0, %c0_i32 : i32
    %c0_i32_0 = arith.constant 0 : i32
    %1 = arith.cmpi eq, %arg1, %c0_i32_0 : i32
    %2 = arith.andi %0, %1 : i1
    %3 = arith.extui %2 : i1 to i32
    %c0_i32_1 = arith.constant 0 : i32
    %4 = arith.cmpi ne, %3, %c0_i32_1 : i32
    scf.if %4 {
      %cst = arith.constant 0.000000e+00 : f32
      %c0_9 = arith.constant 0 : index
      %17 = memref.load %arg4[%c0_9] : memref<2xf32, #tpu.memory_space<smem>>
      memref.store %cst, %arg4[%c0_9] : memref<2xf32, #tpu.memory_space<smem>>
      %cst_10 = arith.constant 0.000000e+00 : f32
      %c1 = arith.constant 1 : index
      %18 = memref.load %arg4[%c1] : memref<2xf32, #tpu.memory_space<smem>>
      memref.store %cst_10, %arg4[%c1] : memref<2xf32, #tpu.memory_space<smem>>
    } else {
    }
    %c0 = arith.constant 0 : index
    %c0_2 = arith.constant 0 : index
    %5 = vector.load %arg2[%c0, %c0_2] : memref<4x512xf32, #tpu.memory_space<vmem>>, vector<4x512xf32>
    %c0_i32_3 = arith.constant 0 : i32
    %6 = arith.cmpi eq, %arg0, %c0_i32_3 : i32
    %7 = arith.extui %6 : i1 to i32
    %c0_i32_4 = arith.constant 0 : i32
    %8 = arith.cmpi ne, %7, %c0_i32_4 : i32
    scf.if %8 {
      %c0_9 = arith.constant 0 : index
      %17 = memref.load %arg4[%c0_9] : memref<2xf32, #tpu.memory_space<smem>>
      %18 = vector.shape_cast %5 : vector<4x512xf32> to vector<1x4x512xf32>
      %cst = arith.constant dense<0.000000e+00> : vector<1xf32>
      %19 = vector.multi_reduction <add>, %18, %cst [1, 2] : vector<1x4x512xf32> to vector<1xf32>
      %20 = vector.shape_cast %19 : vector<1xf32> to vector<1x1x1xf32>
      %21 = vector.extract %20[0, 0, 0] : f32 from vector<1x1x1xf32>
      %22 = arith.addf %17, %21 : f32
      %c0_10 = arith.constant 0 : index
      %23 = memref.load %arg4[%c0_10] : memref<2xf32, #tpu.memory_space<smem>>
      memref.store %22, %arg4[%c0_10] : memref<2xf32, #tpu.memory_space<smem>>
    } else {
    }
    %c1_i32 = arith.constant 1 : i32
    %9 = arith.cmpi eq, %arg0, %c1_i32 : i32
    %10 = arith.extui %9 : i1 to i32
    %c0_i32_5 = arith.constant 0 : i32
    %11 = arith.cmpi ne, %10, %c0_i32_5 : i32
    scf.if %11 {
      %c0_9 = arith.constant 0 : index
      %17 = memref.load %arg4[%c0_9] : memref<2xf32, #tpu.memory_space<smem>>
      %cst = arith.constant 2.048000e+03 : f32
      %18 = arith.divf %17, %cst : f32
      %19 = vector.broadcast %18 : f32 to vector<4x512xf32>
      %20 = arith.subf %5, %19 : vector<4x512xf32>
      %c1 = arith.constant 1 : index
      %21 = memref.load %arg4[%c1] : memref<2xf32, #tpu.memory_space<smem>>
      %22 = arith.mulf %20, %20 : vector<4x512xf32>
      %23 = vector.shape_cast %22 : vector<4x512xf32> to vector<1x4x512xf32>
      %cst_10 = arith.constant dense<0.000000e+00> : vector<1xf32>
      %24 = vector.multi_reduction <add>, %23, %cst_10 [1, 2] : vector<1x4x512xf32> to vector<1xf32>
      %25 = vector.shape_cast %24 : vector<1xf32> to vector<1x1x1xf32>
      %26 = vector.extract %25[0, 0, 0] : f32 from vector<1x1x1xf32>
      %27 = arith.addf %21, %26 : f32
      %c1_11 = arith.constant 1 : index
      %28 = memref.load %arg4[%c1_11] : memref<2xf32, #tpu.memory_space<smem>>
      memref.store %27, %arg4[%c1_11] : memref<2xf32, #tpu.memory_space<smem>>
    } else {
    }
    %c1_i32_6 = arith.constant 1 : i32
    %12 = arith.cmpi eq, %arg0, %c1_i32_6 : i32
    %c0_i32_7 = arith.constant 0 : i32
    %13 = arith.cmpi eq, %arg1, %c0_i32_7 : i32
    %14 = arith.andi %12, %13 : i1
    %15 = arith.extui %14 : i1 to i32
    %c0_i32_8 = arith.constant 0 : i32
    %16 = arith.cmpi ne, %15, %c0_i32_8 : i32
    scf.if %16 {
      %c0_9 = arith.constant 0 : index
      %17 = memref.load %arg4[%c0_9] : memref<2xf32, #tpu.memory_space<smem>>
      %c0_10 = arith.constant 0 : index
      %18 = memref.load %arg3[%c0_10] : memref<2xf32, #tpu.memory_space<smem>>
      memref.store %17, %arg3[%c0_10] : memref<2xf32, #tpu.memory_space<smem>>
      %c1 = arith.constant 1 : index
      %19 = memref.load %arg4[%c1] : memref<2xf32, #tpu.memory_space<smem>>
      %c1_11 = arith.constant 1 : index
      %20 = memref.load %arg3[%c1_11] : memref<2xf32, #tpu.memory_space<smem>>
      memref.store %19, %arg3[%c1_11] : memref<2xf32, #tpu.memory_space<smem>>
    } else {
    }
    return
  }
  func.func @transform_0(%arg0: i32, %arg1: i32) -> (i32, i32) {
    %c0_i32 = arith.constant 0 : i32
    %c0_i32_0 = arith.constant 0 : i32
    return %arg1, %c0_i32 : i32, i32
  }
  func.func @transform_1(%arg0: i32, %arg1: i32) -> i32 {
    %c0_i32 = arith.constant 0 : i32
    %c0_i32_0 = arith.constant 0 : i32
    return %c0_i32 : i32
  }
}

module attributes {stable_mosaic.version = 11 : i64} {
  func.func @_apply_kernel(%arg0: i32, %arg1: memref<8x1xf32, #tpu.memory_space<vmem>>, %arg2: memref<8x1xf32, #tpu.memory_space<vmem>>, %arg3: memref<8x256xf32, #tpu.memory_space<vmem>>, %arg4: memref<8x256xf32, #tpu.memory_space<vmem>>) attributes {dimension_semantics = [#tpu.dimension_semantics<parallel>], iteration_bounds = array<i64: 1>, scalar_prefetch = 0 : i64, scratch_operands = 0 : i64, tpu.core_type = #tpu.core_type<tc>, window_params = [{pipeline_mode = #tpu.pipeline_mode<synchronous>, transform_indices = @transform_0, window_bounds = array<i64: 8, 1>}, {pipeline_mode = #tpu.pipeline_mode<synchronous>, transform_indices = @transform_1, window_bounds = array<i64: 8, 1>}, {transform_indices = @transform_2, window_bounds = array<i64: 8, 256>}, {transform_indices = @transform_3, window_bounds = array<i64: 8, 256>}]} {
    %c0 = arith.constant 0 : index
    %c0_0 = arith.constant 0 : index
    %0 = vector.load %arg3[%c0, %c0_0] : memref<8x256xf32, #tpu.memory_space<vmem>>, vector<8x256xf32>
    %c0_1 = arith.constant 0 : index
    %c0_2 = arith.constant 0 : index
    %1 = vector.load %arg1[%c0_1, %c0_2] : memref<8x1xf32, #tpu.memory_space<vmem>>, vector<8x1xf32>
    %2 = vector.broadcast %1 : vector<8x1xf32> to vector<8x256xf32>
    %3 = arith.mulf %0, %2 : vector<8x256xf32>
    %c0_3 = arith.constant 0 : index
    %c0_4 = arith.constant 0 : index
    %4 = vector.load %arg2[%c0_3, %c0_4] : memref<8x1xf32, #tpu.memory_space<vmem>>, vector<8x1xf32>
    %5 = vector.broadcast %4 : vector<8x1xf32> to vector<8x256xf32>
    %6 = arith.addf %3, %5 : vector<8x256xf32>
    %c0_5 = arith.constant 0 : index
    %c0_6 = arith.constant 0 : index
    %7 = vector.load %arg4[%c0_5, %c0_6] : memref<8x256xf32, #tpu.memory_space<vmem>>, vector<8x256xf32>
    tpu.vector_store %arg4[%c0_5, %c0_6], %6 {strides = array<i32>} : memref<8x256xf32, #tpu.memory_space<vmem>>, vector<8x256xf32>,
    return
  }
  func.func @transform_0(%arg0: i32) -> (i32, i32) {
    %c0_i32 = arith.constant 0 : i32
    %c0_i32_0 = arith.constant 0 : i32
    %c0_i32_1 = arith.constant 0 : i32
    return %c0_i32, %c0_i32_0 : i32, i32
  }
  func.func @transform_1(%arg0: i32) -> (i32, i32) {
    %c0_i32 = arith.constant 0 : i32
    %c0_i32_0 = arith.constant 0 : i32
    %c0_i32_1 = arith.constant 0 : i32
    return %c0_i32, %c0_i32_0 : i32, i32
  }
  func.func @transform_2(%arg0: i32) -> (i32, i32) {
    %c0_i32 = arith.constant 0 : i32
    %c0_i32_0 = arith.constant 0 : i32
    return %c0_i32, %arg0 : i32, i32
  }
  func.func @transform_3(%arg0: i32) -> (i32, i32) {
    %c0_i32 = arith.constant 0 : i32
    %c0_i32_0 = arith.constant 0 : i32
    return %c0_i32, %arg0 : i32, i32
  }
}

</mosaic_0001>

<bundles_post_ra>
// kernel: adain_forward.3
= control target key start
LH: loop header
LB: loop body
LE: loop exit
PB: predicated region body
PF: predicated region fallthrough
CT: control target
= control target key end

     0   :  { %v40_v0 = vmov 0   ;;  %s79_s0 = inlined_call_operand.vmem [shape: f32[8,1], index: 0, kind: input, shape index: {}]   ;;  %s80_s1 = inlined_call_operand.vmem [shape: f32[8,1], index: 1, kind: input, shape index: {}]   ;;  %s81_s2 = inlined_call_operand.vmem [shape: f32[8,256], index: 2, kind: input, shape index: {}]   ;;  %s82_s3 = inlined_call_operand.vmem [shape: f32[8,256], index: 3, kind: output, shape index: {}]  }
   0x1   :  { %39 = vset.pattern.permute.xlu0 %v40_v0  ;;  %v16_v1 = vld [vmem:[%s79_s0] sm:$0xff]  ;;  %v15_v4 = vld [vmem:[%s81_s2 + $0x8] sm:$0xff] }
   0x2   :  { %19 = vperm.xlu0 %39, %v16_v1   ;;  %v24_v2 = vld [vmem:[%s80_s1] sm:$0xff] }
   0x3   :  { %v14_v3 = vld [vmem:[%s81_s2] sm:$0xff] }
   0x6   :  { %27 = vperm.xlu0 %39, %v24_v2  }
  0x81   :  { %v20_v5 = vpop.permute.xlu0 %19 }
  0x82   :  { %v22_v6 = vmul.f32 %v20_v5, %v14_v3  ;;  %v23_v7 = vmul.f32 %v20_v5, %v15_v4 }
  0x85   :  { %v28_v8 = vpop.permute.xlu0 %27 }
  0x86   :  { %v30_v9 = vadd.f32 %v28_v8, %v22_v6  ;;  %v31_v10 = vadd.f32 %v28_v8, %v23_v7 }
  0x88   :  { %32 = vst [vmem:[%s82_s3] sm:$0xff] %v30_v9  ;;  %33 = vst [vmem:[%s82_s3 + $0x8] sm:$0xff] %v31_v10 }

// kernel: adain_forward.2
= control target key start
LH: loop header
LB: loop body
LE: loop exit
PB: predicated region body
PF: predicated region fallthrough
CT: control target
= control target key end

     0   :  { %6 = vsyncpa [#allocation4], 0  ;;  %s376_s6 = smov 0   ;;  %s378_s7 = smov 0   ;;  %s437_s0 = inlined_call_operand.vmem [shape: f32[4,512], index: 0, kind: input, shape index: {}]   ;;  %s438_s1 = inlined_call_operand.vmem [shape: f32[2], index: 1, kind: output, shape index: {}]  }
   0x1   :  { %s380_s8 = smov 0  }
   0x2 LB: > { %s266_s9 = sadd.s32 4294967295, %s362_s8   ;;  %s24_s10 = sadd.s32 1, %s358_s7  ;;  %s362_s8 = sphi %s380_s8, %s12_s8   ;;  %s358_s7 = sphi %s378_s7, %s441_s7   ;;  %s354_s6 = sphi %s376_s6, %s440_s6  }
   0x3   : > { %p26_p0 = scmp.ge.s32.totalorder %s24_s10, 2  ;;  %p269_p1 = scmp.ge.s32.totalorder %s362_s8, 1 }
   0x4   : > { %p95_p2 = scmp.lt.s32.totalorder %s362_s8, 3 }
   0x5   : > { %s443_s10 = smov (%p26_p0, %s24_s10), 0 }
   0x6   : > { %p96_p3 = pnand %p269_p1, %p95_p2 }
   0x7   : > { %p115_p4 = scmp.eq.s32.totalorder (!%p96_p3), %s354_s6, 0  ;;  %v125_v0 = vld [vmem:[%s437_s0] sm:$0xff] (!%p96_p3)  ;;  %v126_v1 = vld [vmem:[%s437_s0 + $0x8] sm:$0xff] (!%p96_p3)  ;;  %s364_s15 = smov (!%p96_p3), 0.0  }
   0x8   : > { %99 = sbr.rel (%p96_p3) target bundleno = 479 (0x1df), region = 24  ;;  %p271_p5 = scmp.ne.s32.totalorder (!%p96_p3), %s354_s6, 0 }
   0xf   : > { %286 = sst [smem:[#allocation2]] (%p115_p4), %s364_s15  ;;  %129 = sbr.rel (%p271_p5) target bundleno = 232 (0xe8), region = 32 }
  0x10   : > { %287 = sst [smem:[#allocation2 + $0x1]] (%p115_p4), %s364_s15  ;;  %v133_v2 = vcombine.high (!%p271_p5), %v125_v0, %v125_v0  ;;  %v134_v3 = vcombine.high (!%p271_p5), %v126_v1, %v126_v1  ;;  %vm137_vm0 = vcmask (!%p271_p5), 1043456   ;;  %s130_s16 = sld [smem:[#allocation2]] (!%p271_p5) }
  0x11   : > { %v138_v4 = vsel (!%p271_p5), %vm137_vm0, %v125_v0, 0.0  ;;  %v141_v6 = vsel (!%p271_p5), %vm137_vm0, %v126_v1, 0.0 }
  0x12   : > { %v139_v5 = vsel (!%p271_p5), %vm137_vm0, %v133_v2, 0.0  ;;  %v143_v8 = vsel (!%p271_p5), %vm137_vm0, %v134_v3, 0.0 }
  0x13   : > { %v140_v7 = vadd.f32 (!%p271_p5), %v139_v5, %v138_v4 }
  0x15   : > { %v142_v9 = vadd.f32 (!%p271_p5), %v141_v6, %v140_v7 }
  0x17   : > { %v144_v10 = vadd.f32 %v143_v8, %v142_v9 }
  0x19   : > { %145 = vadd.xlane.f32.xlu0 %v144_v10 }
  0xa6   : > { %v146_v11 = vpop.xlane.xlu0 %145 }
  0xa7   : > { %v147_v12 = vrot.slane %v146_v11, 4 }
  0xa9   : > { %v148_v13 = vadd.f32 %v147_v12, %v146_v11 }
  0xab   : > { %v149_v14 = vrot.slane %v148_v13, 2 }
  0xad   : > { %v150_v15 = vadd.f32 %v149_v14, %v148_v13 }
  0xaf   : > { %v151_v16 = vrot.slane %v150_v15, 1 }
  0xb1   : > { %v152_v17 = vadd.f32 %v151_v16, %v150_v15 }
  0xb3   : > { %282 = vpush %v152_v17 }
  0xe4   : > { %s283_s17 = spop %282 }
  0xe5   : > { %s154_s18 = sadd.f32 %s283_s17, %s130_s16 }
  0xe7   : > { %156 = sst [smem:[#allocation2]] %s154_s18 }
  0xe8 PF: > { %p157_p6 = scmp.eq.s32.totalorder %s354_s6, 1  ;;  %p272_p7 = scmp.ne.s32.totalorder %s354_s6, 1 }
  0xe9   : > { %s161_s19 = sld [smem:[#allocation2]] (!%p272_p7)  ;;  %vm177_vm1 = vcmask (!%p272_p7), 1043456   ;;  %s273_s21 = sld [smem:[#allocation2 + $0x1]] (!%p272_p7) }
  0xea   : > { %160 = sbr.rel (%p272_p7) target bundleno = 462 (0x1ce), region = 36 }
  0xef   : > { %s164_s20 = smul.f32 (!%p272_p7), 0.00048828125, %s161_s19 }
  0xf1   : > { %v165_v18 = vstv %s164_s20 }
  0xf2   : > { %v166_v19 = vsub.f32 %v125_v0, %v165_v18  ;;  %v167_v20 = vsub.f32 %v126_v1, %v165_v18 }
  0xf4   : > { %v169_v21 = vmul.f32 %v166_v19, %v166_v19  ;;  %v170_v22 = vmul.f32 %v167_v20, %v167_v20 }
  0xf6   : > { %v173_v23 = vcombine.high %v169_v21, %v169_v21  ;;  %v174_v24 = vcombine.high %v170_v22, %v170_v22  ;;  %v178_v25 = vsel %vm177_vm1, %v169_v21, 0.0  ;;  %v181_v27 = vsel %vm177_vm1, %v170_v22, 0.0 }
  0xf8   : > { %v179_v26 = vsel %vm177_vm1, %v173_v23, 0.0  ;;  %v183_v29 = vsel %vm177_vm1, %v174_v24, 0.0 }
  0xf9   : > { %v180_v28 = vadd.f32 %v179_v26, %v178_v25 }
  0xfb   : > { %v182_v30 = vadd.f32 %v181_v27, %v180_v28 }
  0xfd   : > { %v184_v31 = vadd.f32 %v183_v29, %v182_v30 }
  0xff   : > { %185 = vadd.xlane.f32.xlu0 %v184_v31 }
 0x18c   : > { %v186_v32 = vpop.xlane.xlu0 %185 }
 0x18d   : > { %v187_v33 = vrot.slane %v186_v32, 4 }
 0x18f   : > { %v188_v34 = vadd.f32 %v187_v33, %v186_v32 }
 0x191   : > { %v189_v35 = vrot.slane %v188_v34, 2 }
 0x193   : > { %v190_v36 = vadd.f32 %v189_v35, %v188_v34 }
 0x195   : > { %v191_v37 = vrot.slane %v190_v36, 1 }
 0x197   : > { %v192_v38 = vadd.f32 %v191_v37, %v190_v36 }
 0x199   : > { %284 = vpush %v192_v38 }
 0x1ca   : > { %s285_s22 = spop %284 }
 0x1cb   : > { %s194_s23 = sadd.f32 %s285_s22, %s273_s21 }
 0x1cd   : > { %196 = sst [smem:[#allocation2 + $0x1]] %s194_s23 }
 0x1ce PF: > { %s201_s24 = sld [smem:[#allocation2]]  ;;  %s275_s25 = sld [smem:[#allocation2 + $0x1]] }
 0x1cf   : > { %s214_s28 = sshll.u32 %s438_s1, 4  ;;  %p412_p8 = scmp.eq.s32.totalorder %s266_s9, 1  ;;  %s215_s28 = int_to_ptr.vmem [resolvable:$true] %s214_s28 }
 0x1d0   : > { %s322_s30 = scalar_lea.vmem %s215_s28, 16  ;;  %p329_p12 = scmp.lt.s32.totalorder %s215_s28, %s215_s28 }
 0x1d1   : > { %p323_p9 = scmp.ne.s32.totalorder %s215_s28, %s322_s30  ;;  %p330_p13 = scmp.lt.s32.totalorder %s322_s30, %s322_s30 }
 0x1d3   : > { %p324_p10 = pnand %p323_p9, %p412_p8  ;;  %p331_p0 = por %p330_p13, %p329_p12 }
 0x1d4   : > { %288 = sst [smem:[#allocation3]] (%p157_p6), %s201_s24 }
 0x1d5   : > { %289 = sst [smem:[#allocation3 + $0x1]] (%p157_p6), %s275_s25  ;;  %p325_p11 = pneg %p324_p10 }
 0x1d7   : > { %p332_p1 = pnand %p331_p0, %p325_p11 }
 0x1d9   : > { %335 = shalt.err (!%p332_p1)
}
 0x1da   : > { %s365_s2 = smov [#allocation3]  }
 0x1db   : > { %291 = dma.smem_to_vmem (%p412_p8), %s365_s2, 16, %s215_s28, [#allocation4]  }
 0x1dc   : > { %349 = dma.done.wait (%p412_p8), [#allocation4], 16  }
 0x1dd   : > { %351 = vsyncadd (%p412_p8), [#allocation4], 4294967280 }
 0x1de   : > { %222 = sfence }
 0x1df PF: > { %s12_s8 = sadd.s32 1, %s362_s8   ;;  %s440_s6 = smov %s358_s7 }
 0x1e0   : > { %p9_p2 = scmp.ge.s32.totalorder %s12_s8, 4   ;;  %s441_s7 = smov %s443_s10 }
 0x1e2   :  { %11 = sbr.rel (!%p9_p2) target bundleno = 2 (0x2), region = 73 }
 0x1e9   :  { %228 = vsyncpa [#allocation4], 1 }
 0x1ea   :  { %230 = vsyncpa [#allocation4 + $0x1], 1 }

</bundles_post_ra>
